<compile_context>
chip_gen: v6e
topology: v6e:2x2x1
jax: 0.10.0
libtpu: 0.0.40
codegen_flags: <defaults>
</compile_context>

<pallas_src>
import functools

import jax
import jax.numpy as jnp
from jax.experimental import pallas as pl
from jax.experimental.pallas import tpu as pltpu

BN_EPS = 1e-5
C_OUT = 128        # conv / fc hidden channels
C2 = 2 * C_OUT     # fused conv output channels (conv_1 | conv_2)


def _pick_tile(n, target):
    """Largest multiple-of-8 tile <= target; falls back to the full dim (always legal)."""
    t = max(8, (min(int(target), n) // 8) * 8)
    return n if t >= n else t


# --------------------------------------------------------------------------- pass 1
def conv_stats_kernel(a_ref, w_ref, b_ref, conv_ref, stats_ref, *, total_rows, tile_rows):
    """Fused conv_1|conv_2 matmul over one row tile + per-tile BN partial stats."""
    conv = jnp.dot(a_ref[...], w_ref[...], preferred_element_type=jnp.float32)
    conv = conv + b_ref[...]                                   # (tile_rows, 256) f32
    conv_ref[...] = conv.astype(conv_ref.dtype)                # bf16 staging by default

    # BN partial sums from the f32 value (pre-cast); mask rows past the end of the array
    valid = total_rows - pl.program_id(0) * tile_rows
    rows = jax.lax.broadcasted_iota(jnp.int32, (tile_rows, 1), 0)
    c1 = jnp.where(rows < valid, conv[:, :C_OUT], 0.0)         # conv_1 half feeds BN
    stats_ref[0:1, 0:1, :] = jnp.sum(c1, axis=0, keepdims=True)[None]
    stats_ref[0:1, 1:2, :] = jnp.sum(c1 * c1, axis=0, keepdims=True)[None]


# --------------------------------------------------------------------------- pass 2
def bn_gate_maxpool_kernel(conv_ref, scale_ref, shift_ref, out_ref, *,
                           seq_len, tile_t, tiles_per_split):
    """BN1 (scale/shift) * sigmoid gate, running per-(split, batch) max over time."""
    t = pl.program_id(2)
    x = conv_ref[0].astype(jnp.float32)                        # VPU math in f32 (v5e-safe)
    bn1 = x[:, :C_OUT] * scale_ref[...] + shift_ref[...]
    gate = jax.nn.sigmoid(x[:, C_OUT:])
    y = bn1 * gate                                             # (tile_t, 128)

    # mask time rows past the end of the (possibly ragged) last tile
    tt = pl.program_id(0) * tiles_per_split + t                # global time-tile index
    rows = jax.lax.broadcasted_iota(jnp.int32, (tile_t, 1), 0)
    y = jnp.where(rows < (seq_len - tt * tile_t), y, -jnp.inf)
    tile_max = jnp.max(y, axis=0, keepdims=True)[None, None]   # (1, 1, 1, 128)

    @pl.when(t == 0)
    def _():
        out_ref[...] = tile_max

    @pl.when(t > 0)
    def _():
        out_ref[...] = jnp.maximum(out_ref[...], tile_max)


# --------------------------------------------------------------------------- pass 3
def fc_tail_kernel(pooled_ref, wf1_ref, bf1_ref, gamma_ref, beta_ref,
                   wf2_ref, bf2_ref, out_ref):
    pooled = pooled_ref[...]                                         # (B, 128)
    h = jnp.dot(pooled, wf1_ref[...], preferred_element_type=jnp.float32) + bf1_ref[...]
    mean = jnp.mean(h, axis=0, keepdims=True)
    var = jnp.mean((h - mean) ** 2, axis=0, keepdims=True)
    bn = (h - mean) * jax.lax.rsqrt(var + BN_EPS) * gamma_ref[...] + beta_ref[...]
    out_ref[...] = (
        jnp.dot(bn, wf2_ref[...], preferred_element_type=jnp.float32) + bf2_ref[...]
    )


# --------------------------------------------------------------------------- wrapper
def malconv_forward(tokens, params, *, window_size, conv_dtype=jnp.bfloat16,
                    row_tile_target=None, t_tile_target=None):
    B, L = tokens.shape
    W = window_size
    T = L // W
    N = B * T
    K = 8 * W

    # ---- glue: embedding lookup emitted directly in the MXU dtype (no extra f32 stream)
    # TODO(synk): do the 257x8 gather in-kernel so pass 1 only reads int32 tokens.
    emb = jnp.take(params["embed_w"].astype(conv_dtype), tokens[:, :T * W], axis=0)
    a = emb.reshape(N, K)            # row = one window (k*8 + c); ragged K, no pad copy

    # fused conv weight (K, 256); the window/channel permutation is folded in here so the
    # activations need no transposed copies.  cols 0:128 = conv_1, 128:256 = conv_2.
    w1 = params["conv1_w"]                                       # (128, 4, W)
    w2 = params["conv2_w"]
    wf = jnp.zeros((W, 8, C2), jnp.float32)
    wf = wf.at[:, 0:4, 0:C_OUT].set(jnp.transpose(w1, (2, 1, 0)))   # emb ch 0:4 -> conv_1
    wf = wf.at[:, 4:8, C_OUT:].set(jnp.transpose(w2, (2, 1, 0)))    # emb ch 4:8 -> conv_2
    wf = wf.reshape(K, C2).astype(conv_dtype)
    bcat = jnp.concatenate([params["conv1_b"], params["conv2_b"]]).reshape(1, C2)
    bcat = bcat.astype(jnp.float32)

    # ---- generation-aware tiling + explicit VMEM budget (sized for bf16 operands) ----
    try:
        vmem_cap = getattr(pltpu.get_tpu_info(), "vmem_capacity_bytes", 64 * 2**20)
    except Exception:  # pragma: no cover - conservative fallback
        vmem_cap = 64 * 2**20
    big_vmem = vmem_cap >= 100 * 2**20          # v5e/v6e 128 MiB vs v7x 64 MiB
    itm = jnp.dtype(conv_dtype).itemsize
    if row_tile_target is None:
        row_tile_target = 2048 if big_vmem else 1024
        if itm >= 4:                            # f32 fallback: halve the tile
            row_tile_target //= 2
    if t_tile_target is None:
        t_tile_target = 4096 if big_vmem else 2048

    tile_rows = _pick_tile(N, row_tile_target)
    num_row_tiles = pl.cdiv(N, tile_rows)

    est = (2 * tile_rows * K * itm              # A tile (double-buffered)
           + 2 * K * C2 * itm                   # fused weight
           + 2 * C2 * 4                         # bias
           + 2 * tile_rows * C2 * itm           # staged conv output tile
           + 2 * 2 * C_OUT * 4)                 # per-tile stats
    vmem_limit = int(max(16 * 2**20, min(est * 13 // 10, int(vmem_cap * 0.9))))

    # ---- pass 1: fused conv matmul, bf16-staged activations + f32 BN partial stats ----
    conv_out, stats = pl.pallas_call(
        functools.partial(conv_stats_kernel, total_rows=N, tile_rows=tile_rows),
        out_shape=(
            jax.ShapeDtypeStruct((N, C2), conv_dtype),
            jax.ShapeDtypeStruct((num_row_tiles, 2, C_OUT), jnp.float32),
        ),
        grid=(num_row_tiles,),
        in_specs=[
            pl.BlockSpec((tile_rows, K), lambda i: (i, 0)),
            pl.BlockSpec((K, C2), lambda i: (0, 0)),
            pl.BlockSpec((1, C2), lambda i: (0, 0)),
        ],
        out_specs=(
            pl.BlockSpec((tile_rows, C2), lambda i: (i, 0)),
            pl.BlockSpec((1, 2, C_OUT), lambda i: (i, 0, 0)),
        ),
        compiler_params=pltpu.CompilerParams(
            dimension_semantics=("parallel",),
            vmem_limit_bytes=vmem_limit,
        ),
    )(a, wf, bcat)

    # ---- combine exact BN1 statistics over all B*T rows (tiny, f32) ----
    n_rows = jnp.float32(N)
    sum1 = jnp.sum(stats[:, 0, :], axis=0)
    sumsq1 = jnp.sum(stats[:, 1, :], axis=0)
    mean1 = sum1 / n_rows
    var1 = jnp.maximum(sumsq1 / n_rows - mean1 * mean1, 0.0)   # biased (training-mode) var
    inv1 = jax.lax.rsqrt(var1 + BN_EPS)
    scale1 = (params["bn_gamma"] * inv1).reshape(1, C_OUT)
    shift1 = (params["bn_beta"] - mean1 * params["bn_gamma"] * inv1).reshape(1, C_OUT)

    # ---- pass 2: BN + sigmoid gating + per-batch running max pool ----
    conv_bt = conv_out.reshape(B, T, C2)                        # free view
    tile_t = _pick_tile(T, t_tile_target)
    num_t_tiles = pl.cdiv(T, tile_t)
    # v7x megacore: when the batch alone can't fill 2 TensorCores (odd B), split the
    # time axis into a leading parallel axis of 2 and combine with one jnp.max below.
    p_split = 2 if (B % 2 == 1 and num_t_tiles % 2 == 0 and num_t_tiles >= 2) else 1
    tiles_per_split = num_t_tiles // p_split

    pooled = pl.pallas_call(
        functools.partial(bn_gate_maxpool_kernel, seq_len=T, tile_t=tile_t,
                          tiles_per_split=tiles_per_split),
        out_shape=jax.ShapeDtypeStruct((p_split, B, 1, C_OUT), jnp.float32),
        grid=(p_split, B, tiles_per_split),
        in_specs=[
            pl.BlockSpec((1, tile_t, C2), lambda s, b, t: (b, s * tiles_per_split + t, 0)),
            pl.BlockSpec((1, C_OUT), lambda s, b, t: (0, 0)),
            pl.BlockSpec((1, C_OUT), lambda s, b, t: (0, 0)),
        ],
        out_specs=pl.BlockSpec((1, 1, 1, C_OUT), lambda s, b, t: (s, b, 0, 0)),
        compiler_params=pltpu.CompilerParams(
            dimension_semantics=("parallel", "parallel", "arbitrary"),
        ),
    )(conv_bt, scale1, shift1)
    pooled = jnp.max(pooled, axis=0).reshape(B, C_OUT)          # combine split partials

    # ---- pass 3: tiny FC tail (fc_1 -> BN2 -> fc_2), lane-dense padded fc_2 ----
    wf2 = jnp.zeros((C_OUT, C_OUT), jnp.float32).at[:, 0].set(
        params["fc2_w"].reshape(C_OUT))
    bf2 = jnp.broadcast_to(params["fc2_b"].reshape(1, 1), (1, C_OUT))
    vmem_spec = pl.BlockSpec(memory_space=pltpu.MemorySpace.VMEM)

    out = pl.pallas_call(
        fc_tail_kernel,
        out_shape=jax.ShapeDtypeStruct((B, C_OUT), jnp.float32),
        in_specs=[vmem_spec] * 7,
        out_specs=vmem_spec,
    )(pooled, params["fc1_w"].T, params["fc1_b"].reshape(1, C_OUT),
      params["bn_gamma"].reshape(1, C_OUT), params["bn_beta"].reshape(1, C_OUT),
      wf2, bf2)

    return out[:, :1]                                           # (B, 1)


# --------------------------------------------------------------------------- reference
def malconv_reference(tokens, params, *, window_size, quantize_like_kernel=False):
    """Pure-JAX reference mirroring the PyTorch forward (training-mode BN).

    With quantize_like_kernel=True it applies exactly the bf16 roundings the kernel
    performs (bf16 embedding / conv weights as MXU operands, bf16 staging of the conv
    activations) while keeping f32 accumulation and f32 BN statistics — so the default
    bf16 kernel path can be checked tightly.
    """
    B, L = tokens.shape
    W = window_size
    T = L // W
    f32 = jnp.float32
    table, w1, w2 = params["embed_w"], params["conv1_w"], params["conv2_w"]
    if quantize_like_kernel:
        q = lambda v: v.astype(jnp.bfloat16).astype(f32)
        table, w1, w2 = q(table), q(w1), q(w2)

    emb = jnp.take(table, tokens[:, :T * W], axis=0).astype(f32)   # (B, T*W, 8)
    x = emb.transpose(0, 2, 1)                                     # (B, 8, T*W)

    def conv(xc, w, b):   # xc: (B, 4, T*W), w: (128, 4, W)
        xw = xc.reshape(B, 4, T, W)
        return jnp.einsum("bctw,ocw->bot", xw, w) + b[None, :, None]

    conv1 = conv(x[:, 0:4, :], w1, params["conv1_b"])              # (B, 128, T)
    conv2 = conv(x[:, 4:8, :], w2, params["conv2_b"])
    m1 = jnp.mean(conv1, axis=(0, 2), keepdims=True)               # stats from f32 value
    v1 = jnp.mean((conv1 - m1) ** 2, axis=(0, 2), keepdims=True)
    if quantize_like_kernel:                                       # kernel stages in bf16
        conv1 = conv1.astype(jnp.bfloat16).astype(f32)
        conv2 = conv2.astype(jnp.bfloat16).astype(f32)
    bn1 = (conv1 - m1) * jax.lax.rsqrt(v1 + BN_EPS)
    bn1 = bn1 * params["bn_gamma"][None, :, None] + params["bn_beta"][None, :, None]

    y = bn1 * jax.nn.sigmoid(conv2)
    pooled = jnp.max(y, axis=2)                                    # (B, 128)

    h = pooled @ params["fc1_w"].T + params["fc1_b"]
    m2 = jnp.mean(h, axis=0, keepdims=True)
    v2 = jnp.mean((h - m2) ** 2, axis=0, keepdims=True)
    bn2 = (h - m2) * jax.lax.rsqrt(v2 + BN_EPS) * params["bn_gamma"] + params["bn_beta"]
    return bn2 @ params["fc2_w"].T + params["fc2_b"]               # (B, 1)


if __name__ == "__main__":
    W = 8
    key = jax.random.PRNGKey(0)
    ks = jax.random.split(key, 16)

    embed_w = 0.1 * jax.random.normal(ks[1], (257, 8), jnp.float32)
    embed_w = embed_w.at[0].set(0.0)  # padding_idx=0 row is zeros
    params = {
        "embed_w": embed_w,
        "conv1_w": 0.1 * jax.random.normal(ks[2], (C_OUT, 4, W), jnp.float32),
        "conv1_b": 0.1 * jax.random.normal(ks[3], (C_OUT,), jnp.float32),
        "conv2_w": 0.1 * jax.random.normal(ks[4], (C_OUT, 4, W), jnp.float32),
        "conv2_b": 0.1 * jax.random.normal(ks[5], (C_OUT,), jnp.float32),
        "bn_gamma": 1.0 + 0.1 * jax.random.normal(ks[6], (C_OUT,), jnp.float32),
        "bn_beta": 0.1 * jax.random.normal(ks[7], (C_OUT,), jnp.float32),
        "fc1_w": 0.1 * jax.random.normal(ks[8], (C_OUT, C_OUT), jnp.float32),
        "fc1_b": 0.1 * jax.random.normal(ks[9], (C_OUT,), jnp.float32),
        "fc2_w": 0.1 * jax.random.normal(ks[10], (1, C_OUT), jnp.float32),
        "fc2_b": 0.1 * jax.random.normal(ks[11], (1,), jnp.float32),
    }

    def run_case(tokens, *, conv_dtype, row_tile_target=None, t_tile_target=None,
                 quantize_ref, tol):
        fwd = jax.jit(functools.partial(
            malconv_forward, window_size=W, conv_dtype=conv_dtype,
            row_tile_target=row_tile_target, t_tile_target=t_tile_target))
        out = jax.block_until_ready(fwd(tokens, params))
        ref = malconv_reference(tokens, params, window_size=W,
                                quantize_like_kernel=quantize_ref)
        assert out.shape == (tokens.shape[0], 1), out.shape
        assert bool(jnp.all(jnp.isfinite(out)))
        assert jnp.allclose(out, ref, atol=tol, rtol=tol), (out, ref)
        return out

    # A) main config: B=4, L=128 (T=16). f32 path vs exact reference, and the default
    #    bf16 path vs the quantization-aware reference.
    tok_a = jax.random.randint(ks[12], (4, 128), 0, 257, dtype=jnp.int32)
    run_case(tok_a, conv_dtype=jnp.float32, quantize_ref=False, tol=5e-3)
    out_bf16 = run_case(tok_a, conv_dtype=jnp.bfloat16, quantize_ref=True, tol=5e-3)
    ref_f32 = malconv_reference(tok_a, params, window_size=W)
    # loose bound on the total bf16 quantization error vs the full-f32 reference
    assert float(jnp.max(jnp.abs(out_bf16 - ref_f32))) < 0.5

    # B) ragged row / time tiles (masked last tiles): B=2, T=21 (L=168)
    tok_b = jax.random.randint(ks[13], (2, 21 * W), 0, 257, dtype=jnp.int32)
    run_case(tok_b, conv_dtype=jnp.bfloat16, row_tile_target=16, t_tile_target=8,
             quantize_ref=True, tol=5e-3)

    # C) odd batch -> pass-2 time-axis split (v7x megacore path): B=3, T=32 (L=256)
    tok_c = jax.random.randint(ks[14], (3, 32 * W), 0, 257, dtype=jnp.int32)
    run_case(tok_c, conv_dtype=jnp.bfloat16, row_tile_target=32, t_tile_target=8,
             quantize_ref=True, tol=5e-3)

    print("KERNEL_OK")
</pallas_src>

<mosaic_0001>
module attributes {stable_mosaic.version = 11 : i64} {
  func.func @conv_stats_kernel(%arg0: i32, %arg1: memref<64x64xf32, #tpu.memory_space<vmem>>, %arg2: memref<64x256xf32, #tpu.memory_space<vmem>>, %arg3: memref<1x256xf32, #tpu.memory_space<vmem>>, %arg4: memref<64x256xf32, #tpu.memory_space<vmem>>, %arg5: memref<1x2x128xf32, #tpu.memory_space<vmem>>) attributes {dimension_semantics = [#tpu.dimension_semantics<parallel>], iteration_bounds = array<i64: 1>, scalar_prefetch = 0 : i64, scratch_operands = 0 : i64, tpu.core_type = #tpu.core_type<tc>, window_params = [{transform_indices = @transform_0, window_bounds = array<i64: 64, 64>}, {pipeline_mode = #tpu.pipeline_mode<synchronous>, transform_indices = @transform_1, window_bounds = array<i64: 64, 256>}, {pipeline_mode = #tpu.pipeline_mode<synchronous>, transform_indices = @transform_2, window_bounds = array<i64: 1, 256>}, {transform_indices = @transform_3, window_bounds = array<i64: 64, 256>}, {transform_indices = @transform_4, window_bounds = array<i64: 1, 2, 128>}]} {
    %c0 = arith.constant 0 : index
    %c0_0 = arith.constant 0 : index
    %0 = vector.load %arg1[%c0, %c0_0] : memref<64x64xf32, #tpu.memory_space<vmem>>, vector<64x64xf32>
    %c0_1 = arith.constant 0 : index
    %c0_2 = arith.constant 0 : index
    %1 = vector.load %arg2[%c0_1, %c0_2] : memref<64x256xf32, #tpu.memory_space<vmem>>, vector<64x256xf32>
    %cst = arith.constant dense<0.000000e+00> : vector<64x256xf32>
    %2 = tpu.matmul %0, %1, %cst {dimension_numbers = #tpu.dot_dimension_numbers<[1], [0], [0], [1], [0, 0, 1, 1], [], []>} : vector<64x64xf32>, vector<64x256xf32>, vector<64x256xf32> -> vector<64x256xf32>
    %c0_3 = arith.constant 0 : index
    %c0_4 = arith.constant 0 : index
    %3 = vector.load %arg3[%c0_3, %c0_4] : memref<1x256xf32, #tpu.memory_space<vmem>>, vector<1x256xf32>
    %4 = vector.broadcast %3 : vector<1x256xf32> to vector<64x256xf32>
    %5 = arith.addf %2, %4 : vector<64x256xf32>
    %c0_5 = arith.constant 0 : index
    %c0_6 = arith.constant 0 : index
    %6 = vector.load %arg4[%c0_5, %c0_6] : memref<64x256xf32, #tpu.memory_space<vmem>>, vector<64x256xf32>
    tpu.vector_store %arg4[%c0_5, %c0_6], %5 {strides = array<i32>} : memref<64x256xf32, #tpu.memory_space<vmem>>, vector<64x256xf32>,
    %c64_i32 = arith.constant 64 : i32
    %7 = arith.muli %arg0, %c64_i32 : i32
    %c64_i32_7 = arith.constant 64 : i32
    %8 = arith.subi %c64_i32_7, %7 : i32
    %9 = tpu.iota {dimensions = array<i32: 0>} : vector<64x1xi32>
    %10 = vector.broadcast %8 : i32 to vector<64x1xi32>
    %11 = arith.cmpi slt, %9, %10 : vector<64x1xi32>
    %12 = vector.extract_strided_slice %5 {offsets = [0, 0], sizes = [64, 128], strides = [1, 1]} : vector<64x256xf32> to vector<64x128xf32>
    %cst_8 = arith.constant 0.000000e+00 : f32
    %13 = vector.shape_cast %11 : vector<64x1xi1> to vector<64x1xi1>
    %14 = vector.broadcast %13 : vector<64x1xi1> to vector<64x128xi1>
    %15 = vector.broadcast %cst_8 : f32 to vector<64x128xf32>
    %16 = arith.select %14, %12, %15 : vector<64x128xi1>, vector<64x128xf32>
    %cst_9 = arith.constant dense<0.000000e+00> : vector<128xf32>
    %17 = vector.multi_reduction <add>, %16, %cst_9 [0] : vector<64x128xf32> to vector<128xf32>
    %18 = vector.shape_cast %17 : vector<128xf32> to vector<1x128xf32>
    %19 = vector.shape_cast %18 : vector<1x128xf32> to vector<1x1x128xf32>
    %c0_10 = arith.constant 0 : index
    %c0_11 = arith.constant 0 : index
    %c0_12 = arith.constant 0 : index
    %20 = vector.load %arg5[%c0_10, %c0_11, %c0_12] : memref<1x2x128xf32, #tpu.memory_space<vmem>>, vector<1x1x128xf32>
    tpu.vector_store %arg5[%c0_10, %c0_11, %c0_12], %19 {strides = array<i32>} : memref<1x2x128xf32, #tpu.memory_space<vmem>>, vector<1x1x128xf32>,
    %21 = arith.mulf %16, %16 : vector<64x128xf32>
    %cst_13 = arith.constant dense<0.000000e+00> : vector<128xf32>
    %22 = vector.multi_reduction <add>, %21, %cst_13 [0] : vector<64x128xf32> to vector<128xf32>
    %23 = vector.shape_cast %22 : vector<128xf32> to vector<1x128xf32>
    %24 = vector.shape_cast %23 : vector<1x128xf32> to vector<1x1x128xf32>
    %c0_14 = arith.constant 0 : index
    %c1 = arith.constant 1 : index
    %c0_15 = arith.constant 0 : index
    %25 = vector.load %arg5[%c0_14, %c1, %c0_15] : memref<1x2x128xf32, #tpu.memory_space<vmem>>, vector<1x1x128xf32>
    tpu.vector_store %arg5[%c0_14, %c1, %c0_15], %24 {strides = array<i32>} : memref<1x2x128xf32, #tpu.memory_space<vmem>>, vector<1x1x128xf32>,
    return
  }
  func.func @transform_0(%arg0: i32) -> (i32, i32) {
    %c0_i32 = arith.constant 0 : i32
    %c0_i32_0 = arith.constant 0 : i32
    return %arg0, %c0_i32 : i32, i32
  }
  func.func @transform_1(%arg0: i32) -> (i32, i32) {
    %c0_i32 = arith.constant 0 : i32
    %c0_i32_0 = arith.constant 0 : i32
    %c0_i32_1 = arith.constant 0 : i32
    return %c0_i32, %c0_i32_0 : i32, i32
  }
  func.func @transform_2(%arg0: i32) -> (i32, i32) {
    %c0_i32 = arith.constant 0 : i32
    %c0_i32_0 = arith.constant 0 : i32
    %c0_i32_1 = arith.constant 0 : i32
    return %c0_i32, %c0_i32_0 : i32, i32
  }
  func.func @transform_3(%arg0: i32) -> (i32, i32) {
    %c0_i32 = arith.constant 0 : i32
    %c0_i32_0 = arith.constant 0 : i32
    return %arg0, %c0_i32 : i32, i32
  }
  func.func @transform_4(%arg0: i32) -> (i32, i32, i32) {
    %c0_i32 = arith.constant 0 : i32
    %c0_i32_0 = arith.constant 0 : i32
    %c0_i32_1 = arith.constant 0 : i32
    return %arg0, %c0_i32, %c0_i32_0 : i32, i32, i32
  }
}

module attributes {stable_mosaic.version = 11 : i64} {
  func.func @bn_gate_maxpool_kernel(%arg0: i32, %arg1: i32, %arg2: i32, %arg3: memref<1x16x256xf32, #tpu.memory_space<vmem>>, %arg4: memref<1x128xf32, #tpu.memory_space<vmem>>, %arg5: memref<1x128xf32, #tpu.memory_space<vmem>>, %arg6: memref<1x1x1x128xf32, #tpu.memory_space<vmem>>) attributes {dimension_semantics = [#tpu.dimension_semantics<parallel>, #tpu.dimension_semantics<parallel>, #tpu.dimension_semantics<arbitrary>], iteration_bounds = array<i64: 1, 4, 1>, scalar_prefetch = 0 : i64, scratch_operands = 0 : i64, tpu.core_type = #tpu.core_type<tc>, window_params = [{transform_indices = @transform_0, window_bounds = array<i64: 1, 16, 256>}, {pipeline_mode = #tpu.pipeline_mode<synchronous>, transform_indices = @transform_1, window_bounds = array<i64: 1, 128>}, {pipeline_mode = #tpu.pipeline_mode<synchronous>, transform_indices = @transform_2, window_bounds = array<i64: 1, 128>}, {transform_indices = @transform_3, window_bounds = array<i64: 1, 1, 1, 128>}]} {
    %c0 = arith.constant 0 : index
    %c0_0 = arith.constant 0 : index
    %c0_1 = arith.constant 0 : index
    %0 = vector.load %arg3[%c0, %c0_0, %c0_1] : memref<1x16x256xf32, #tpu.memory_space<vmem>>, vector<1x16x256xf32>
    %1 = vector.shape_cast %0 : vector<1x16x256xf32> to vector<16x256xf32>
    %2 = vector.extract_strided_slice %1 {offsets = [0, 0], sizes = [16, 128], strides = [1, 1]} : vector<16x256xf32> to vector<16x128xf32>
    %c0_2 = arith.constant 0 : index
    %c0_3 = arith.constant 0 : index
    %3 = vector.load %arg4[%c0_2, %c0_3] : memref<1x128xf32, #tpu.memory_space<vmem>>, vector<1x128xf32>
    %4 = vector.broadcast %3 : vector<1x128xf32> to vector<16x128xf32>
    %5 = arith.mulf %2, %4 : vector<16x128xf32>
    %c0_4 = arith.constant 0 : index
    %c0_5 = arith.constant 0 : index
    %6 = vector.load %arg5[%c0_4, %c0_5] : memref<1x128xf32, #tpu.memory_space<vmem>>, vector<1x128xf32>
    %7 = vector.broadcast %6 : vector<1x128xf32> to vector<16x128xf32>
    %8 = arith.addf %5, %7 : vector<16x128xf32>
    %9 = vector.extract_strided_slice %1 {offsets = [0, 128], sizes = [16, 128], strides = [1, 1]} : vector<16x256xf32> to vector<16x128xf32>
    %10 = arith.negf %9 : vector<16x128xf32>
    %11 = math.exp %10 : vector<16x128xf32>
    %cst = arith.constant 1.000000e+00 : f32
    %12 = vector.broadcast %cst : f32 to vector<16x128xf32>
    %13 = arith.addf %12, %11 : vector<16x128xf32>
    %14 = arith.divf %12, %13 : vector<16x128xf32>
    %15 = arith.mulf %8, %14 : vector<16x128xf32>
    %c1_i32 = arith.constant 1 : i32
    %16 = arith.muli %arg0, %c1_i32 : i32
    %17 = arith.addi %16, %arg2 : i32
    %18 = tpu.iota {dimensions = array<i32: 0>} : vector<16x1xi32>
    %c16_i32 = arith.constant 16 : i32
    %19 = arith.muli %17, %c16_i32 : i32
    %c16_i32_6 = arith.constant 16 : i32
    %20 = arith.subi %c16_i32_6, %19 : i32
    %21 = vector.broadcast %20 : i32 to vector<16x1xi32>
    %22 = arith.cmpi slt, %18, %21 : vector<16x1xi32>
    %cst_7 = arith.constant 0xFF800000 : f32
    %23 = vector.shape_cast %22 : vector<16x1xi1> to vector<16x1xi1>
    %24 = vector.broadcast %23 : vector<16x1xi1> to vector<16x128xi1>
    %25 = vector.broadcast %cst_7 : f32 to vector<16x128xf32>
    %26 = arith.select %24, %15, %25 : vector<16x128xi1>, vector<16x128xf32>
    %cst_8 = arith.constant dense<0xFF800000> : vector<128xf32>
    %27 = vector.multi_reduction <maximumf>, %26, %cst_8 [0] : vector<16x128xf32> to vector<128xf32>
    %28 = vector.shape_cast %27 : vector<128xf32> to vector<1x128xf32>
    %29 = vector.shape_cast %28 : vector<1x128xf32> to vector<1x1x1x128xf32>
    %c0_i32 = arith.constant 0 : i32
    %30 = arith.cmpi eq, %arg2, %c0_i32 : i32
    %31 = arith.extui %30 : i1 to i32
    %c0_i32_9 = arith.constant 0 : i32
    %32 = arith.cmpi ne, %31, %c0_i32_9 : i32
    scf.if %32 {
      %c0_12 = arith.constant 0 : index
      %c0_13 = arith.constant 0 : index
      %c0_14 = arith.constant 0 : index
      %c0_15 = arith.constant 0 : index
      %36 = vector.load %arg6[%c0_12, %c0_13, %c0_14, %c0_15] : memref<1x1x1x128xf32, #tpu.memory_space<vmem>>, vector<1x1x1x128xf32>
      tpu.vector_store %arg6[%c0_12, %c0_13, %c0_14, %c0_15], %29 {strides = array<i32>} : memref<1x1x1x128xf32, #tpu.memory_space<vmem>>, vector<1x1x1x128xf32>,
    } else {
    }
    %c0_i32_10 = arith.constant 0 : i32
    %33 = arith.cmpi sgt, %arg2, %c0_i32_10 : i32
    %34 = arith.extui %33 : i1 to i32
    %c0_i32_11 = arith.constant 0 : i32
    %35 = arith.cmpi ne, %34, %c0_i32_11 : i32
    scf.if %35 {
      %c0_12 = arith.constant 0 : index
      %c0_13 = arith.constant 0 : index
      %c0_14 = arith.constant 0 : index
      %c0_15 = arith.constant 0 : index
      %36 = vector.load %arg6[%c0_12, %c0_13, %c0_14, %c0_15] : memref<1x1x1x128xf32, #tpu.memory_space<vmem>>, vector<1x1x1x128xf32>
      %37 = arith.maximumf %36, %29 : vector<1x1x1x128xf32>
      %c0_16 = arith.constant 0 : index
      %c0_17 = arith.constant 0 : index
      %c0_18 = arith.constant 0 : index
      %c0_19 = arith.constant 0 : index
      %38 = vector.load %arg6[%c0_16, %c0_17, %c0_18, %c0_19] : memref<1x1x1x128xf32, #tpu.memory_space<vmem>>, vector<1x1x1x128xf32>
      tpu.vector_store %arg6[%c0_16, %c0_17, %c0_18, %c0_19], %37 {strides = array<i32>} : memref<1x1x1x128xf32, #tpu.memory_space<vmem>>, vector<1x1x1x128xf32>,
    } else {
    }
    return
  }
  func.func @transform_0(%arg0: i32, %arg1: i32, %arg2: i32) -> (i32, i32, i32) {
    %c1_i32 = arith.constant 1 : i32
    %0 = arith.muli %arg0, %c1_i32 : i32
    %1 = arith.addi %0, %arg2 : i32
    %c0_i32 = arith.constant 0 : i32
    %c0_i32_0 = arith.constant 0 : i32
    return %arg1, %1, %c0_i32 : i32, i32, i32
  }
  func.func @transform_1(%arg0: i32, %arg1: i32, %arg2: i32) -> (i32, i32) {
    %c0_i32 = arith.constant 0 : i32
    %c0_i32_0 = arith.constant 0 : i32
    %c0_i32_1 = arith.constant 0 : i32
    return %c0_i32, %c0_i32_0 : i32, i32
  }
  func.func @transform_2(%arg0: i32, %arg1: i32, %arg2: i32) -> (i32, i32) {
    %c0_i32 = arith.constant 0 : i32
    %c0_i32_0 = arith.constant 0 : i32
    %c0_i32_1 = arith.constant 0 : i32
    return %c0_i32, %c0_i32_0 : i32, i32
  }
  func.func @transform_3(%arg0: i32, %arg1: i32, %arg2: i32) -> (i32, i32, i32, i32) {
    %c0_i32 = arith.constant 0 : i32
    %c0_i32_0 = arith.constant 0 : i32
    %c0_i32_1 = arith.constant 0 : i32
    return %arg0, %arg1, %c0_i32, %c0_i32_0 : i32, i32, i32, i32
  }
}

module attributes {stable_mosaic.version = 11 : i64} {
  func.func @fc_tail_kernel(%arg0: memref<4x128xf32, #tpu.memory_space<vmem>>, %arg1: memref<128x128xf32, #tpu.memory_space<vmem>>, %arg2: memref<1x128xf32, #tpu.memory_space<vmem>>, %arg3: memref<1x128xf32, #tpu.memory_space<vmem>>, %arg4: memref<1x128xf32, #tpu.memory_space<vmem>>, %arg5: memref<128x128xf32, #tpu.memory_space<vmem>>, %arg6: memref<1x128xf32, #tpu.memory_space<vmem>>, %arg7: memref<4x128xf32, #tpu.memory_space<vmem>>) attributes {dimension_semantics = [], scalar_prefetch = 0 : i64, scratch_operands = 0 : i64, tpu.core_type = #tpu.core_type<tc>} {
    %c0 = arith.constant 0 : index
    %c0_0 = arith.constant 0 : index
    %0 = vector.load %arg0[%c0, %c0_0] : memref<4x128xf32, #tpu.memory_space<vmem>>, vector<4x128xf32>
    %c0_1 = arith.constant 0 : index
    %c0_2 = arith.constant 0 : index
    %1 = vector.load %arg1[%c0_1, %c0_2] : memref<128x128xf32, #tpu.memory_space<vmem>>, vector<128x128xf32>
    %cst = arith.constant dense<0.000000e+00> : vector<4x128xf32>
    %2 = tpu.matmul %0, %1, %cst {dimension_numbers = #tpu.dot_dimension_numbers<[1], [0], [0], [1], [0, 0, 1, 1], [], []>} : vector<4x128xf32>, vector<128x128xf32>, vector<4x128xf32> -> vector<4x128xf32>
    %c0_3 = arith.constant 0 : index
    %c0_4 = arith.constant 0 : index
    %3 = vector.load %arg2[%c0_3, %c0_4] : memref<1x128xf32, #tpu.memory_space<vmem>>, vector<1x128xf32>
    %4 = vector.broadcast %3 : vector<1x128xf32> to vector<4x128xf32>
    %5 = arith.addf %2, %4 : vector<4x128xf32>
    %cst_5 = arith.constant dense<0.000000e+00> : vector<128xf32>
    %6 = vector.multi_reduction <add>, %5, %cst_5 [0] : vector<4x128xf32> to vector<128xf32>
    %7 = vector.shape_cast %6 : vector<128xf32> to vector<1x128xf32>
    %cst_6 = arith.constant 4.000000e+00 : f32
    %8 = vector.broadcast %cst_6 : f32 to vector<1x128xf32>
    %9 = arith.divf %7, %8 : vector<1x128xf32>
    %10 = vector.broadcast %9 : vector<1x128xf32> to vector<4x128xf32>
    %11 = arith.subf %5, %10 : vector<4x128xf32>
    %12 = arith.mulf %11, %11 : vector<4x128xf32>
    %cst_7 = arith.constant dense<0.000000e+00> : vector<128xf32>
    %13 = vector.multi_reduction <add>, %12, %cst_7 [0] : vector<4x128xf32> to vector<128xf32>
    %14 = vector.shape_cast %13 : vector<128xf32> to vector<1x128xf32>
    %cst_8 = arith.constant 4.000000e+00 : f32
    %15 = vector.broadcast %cst_8 : f32 to vector<1x128xf32>
    %16 = arith.divf %14, %15 : vector<1x128xf32>
    %17 = vector.broadcast %9 : vector<1x128xf32> to vector<4x128xf32>
    %18 = arith.subf %5, %17 : vector<4x128xf32>
    %cst_9 = arith.constant 9.99999974E-6 : f32
    %19 = vector.broadcast %cst_9 : f32 to vector<1x128xf32>
    %20 = arith.addf %16, %19 : vector<1x128xf32>
    %21 = math.rsqrt %20 : vector<1x128xf32>
    %22 = vector.broadcast %21 : vector<1x128xf32> to vector<4x128xf32>
    %23 = arith.mulf %18, %22 : vector<4x128xf32>
    %c0_10 = arith.constant 0 : index
    %c0_11 = arith.constant 0 : index
    %24 = vector.load %arg3[%c0_10, %c0_11] : memref<1x128xf32, #tpu.memory_space<vmem>>, vector<1x128xf32>
    %25 = vector.broadcast %24 : vector<1x128xf32> to vector<4x128xf32>
    %26 = arith.mulf %23, %25 : vector<4x128xf32>
    %c0_12 = arith.constant 0 : index
    %c0_13 = arith.constant 0 : index
    %27 = vector.load %arg4[%c0_12, %c0_13] : memref<1x128xf32, #tpu.memory_space<vmem>>, vector<1x128xf32>
    %28 = vector.broadcast %27 : vector<1x128xf32> to vector<4x128xf32>
    %29 = arith.addf %26, %28 : vector<4x128xf32>
    %c0_14 = arith.constant 0 : index
    %c0_15 = arith.constant 0 : index
    %30 = vector.load %arg5[%c0_14, %c0_15] : memref<128x128xf32, #tpu.memory_space<vmem>>, vector<128x128xf32>
    %cst_16 = arith.constant dense<0.000000e+00> : vector<4x128xf32>
    %31 = tpu.matmul %29, %30, %cst_16 {dimension_numbers = #tpu.dot_dimension_numbers<[1], [0], [0], [1], [0, 0, 1, 1], [], []>} : vector<4x128xf32>, vector<128x128xf32>, vector<4x128xf32> -> vector<4x128xf32>
    %c0_17 = arith.constant 0 : index
    %c0_18 = arith.constant 0 : index
    %32 = vector.load %arg6[%c0_17, %c0_18] : memref<1x128xf32, #tpu.memory_space<vmem>>, vector<1x128xf32>
    %33 = vector.broadcast %32 : vector<1x128xf32> to vector<4x128xf32>
    %34 = arith.addf %31, %33 : vector<4x128xf32>
    %c0_19 = arith.constant 0 : index
    %c0_20 = arith.constant 0 : index
    %35 = vector.load %arg7[%c0_19, %c0_20] : memref<4x128xf32, #tpu.memory_space<vmem>>, vector<4x128xf32>
    tpu.vector_store %arg7[%c0_19, %c0_20], %34 {strides = array<i32>} : memref<4x128xf32, #tpu.memory_space<vmem>>, vector<4x128xf32>,
    return
  }
}

</mosaic_0001>

<bundles_post_ra>
// kernel: malconv_forward.3
= control target key start
LH: loop header
LB: loop body
LE: loop exit
PB: predicated region body
PF: predicated region fallthrough
CT: control target
= control target key end

     0   :  { %v319_v3 = vmov 0.0   ;;  %vm52_vm0 = vcmask 523264   ;;  %v42_v25 = vlaneseq  ;;  %s490_s1 = inlined_call_operand.vmem [shape: f32[64,256], index: 1, kind: input, shape index: {}]   ;;  %s491_s0 = inlined_call_operand.vmem [shape: f32[64,64], index: 0, kind: input, shape index: {}]   ;;  %s492_s2 = inlined_call_operand.vmem [shape: f32[1,256], index: 2, kind: input, shape index: {}]   ;;  %s493_s3 = inlined_call_operand.vmem [shape: f32[64,256], index: 3, kind: output, shape index: {0}]   ;;  %s494_s4 = inlined_call_operand.vmem [shape: f32[1,2,128], index: 4, kind: output, shape index: {1}]  }
   0x1   :  { %v39_v0 = vld [vmem:[%s490_s1 + $0x78] sm:$0xff]  ;;  %v38_v1 = vld [vmem:[%s490_s1 + $0x70] sm:$0xff]  ;;  %v37_v2 = vld [vmem:[%s490_s1 + $0x68] sm:$0xff]  ;;  %141 = vmatprep.mubr.f32.mxu0 %v319_v3  ;;  %165 = vmatprep.mubr.f32.mxu1 %v319_v3 }
   0x2   :  { %93 = vmatprep.subr.mxu0 %v39_v0  ;;  %v36_v4 = vld [vmem:[%s490_s1 + $0x60] sm:$0xff]  ;;  %302 = vmatprep.subr.mxu1 %v39_v0  ;;  %v35_v5 = vld [vmem:[%s490_s1 + $0x58] sm:$0xff]  ;;  %v34_v6 = vld [vmem:[%s490_s1 + $0x50] sm:$0xff]  ;;  %v43_v26 = vshrl.u32 %v42_v25, 7 }
   0x3   :  { %94 = vmatpush1.msra.mxu0 %v38_v1  ;;  %310 = vmatpush1.msra.mxu1 %v38_v1  ;;  %v33_v7 = vld [vmem:[%s490_s1 + $0x48] sm:$0xff]  ;;  %v32_v8 = vld [vmem:[%s490_s1 + $0x40] sm:$0xff]  ;;  %v31_v9 = vld [vmem:[%s490_s1 + $0x38] sm:$0xff] }
   0x4   :  { %95 = vmatprep.subr.mxu0 %v37_v2  ;;  %303 = vmatprep.subr.mxu1 %v37_v2  ;;  %v30_v10 = vld [vmem:[%s490_s1 + $0x30] sm:$0xff]  ;;  %v29_v11 = vld [vmem:[%s490_s1 + $0x28] sm:$0xff]  ;;  %v28_v12 = vld [vmem:[%s490_s1 + $0x20] sm:$0xff]  ;;  %v44_v27 = vsub.s32 0, %v43_v26  ;;  %v48_v29 = vsub.s32 1, %v43_v26 }
   0x5   :  { %96 = vmatpush1.msra.mxu0 %v36_v4  ;;  %311 = vmatpush1.msra.mxu1 %v36_v4  ;;  %v27_v13 = vld [vmem:[%s490_s1 + $0x18] sm:$0xff]  ;;  %v26_v14 = vld [vmem:[%s490_s1 + $0x10] sm:$0xff]  ;;  %v25_v15 = vld [vmem:[%s490_s1 + $0x8] sm:$0xff] }
   0x6   :  { %97 = vmatprep.subr.mxu0 %v35_v5  ;;  %304 = vmatprep.subr.mxu1 %v35_v5  ;;  %v24_v16 = vld [vmem:[%s490_s1] sm:$0xff]  ;;  %v17_v19 = vld [vmem:[%s491_s0 + $0x8] sm:$0xff]  ;;  %v18_v21 = vld [vmem:[%s491_s0 + $0x10] sm:$0xff] }
   0x7   :  { %98 = vmatpush1.msra.mxu0 %v34_v6  ;;  %312 = vmatpush1.msra.mxu1 %v34_v6  ;;  %v16_v17 = vld [vmem:[%s491_s0] sm:$0xff]  ;;  %v21_v20 = vld [vmem:[%s491_s0 + $0x28] sm:$0xff]  ;;  %v22_v22 = vld [vmem:[%s491_s0 + $0x30] sm:$0xff] }
   0x8   :  { %99 = vmatprep.subr.mxu0 %v33_v7  ;;  %305 = vmatprep.subr.mxu1 %v33_v7  ;;  %v20_v18 = vld [vmem:[%s491_s0 + $0x20] sm:$0xff]  ;;  %v19_v23 = vld [vmem:[%s491_s0 + $0x18] sm:$0xff] }
   0x9   :  { %100 = vmatpush1.msra.mxu0 %v32_v8  ;;  %313 = vmatpush1.msra.mxu1 %v32_v8  ;;  %v23_v24 = vld [vmem:[%s491_s0 + $0x38] sm:$0xff]  ;;  %v40_v28 = vld [vmem:[%s492_s2] sm:$0x3] }
   0xa   :  { %101 = vmatprep.subr.mxu0 %v31_v9  ;;  %306 = vmatprep.subr.mxu1 %v31_v9  ;;  %v45_v30 = vrot.slane %v40_v28, %v44_v27  ;;  %v49_v31 = vrot.slane %v40_v28, %v48_v29 }
   0xb   :  { %102 = vmatpush1.msra.mxu0 %v30_v10  ;;  %314 = vmatpush1.msra.mxu1 %v30_v10 }
   0xc   :  { %103 = vmatprep.subr.mxu0 %v29_v11  ;;  %307 = vmatprep.subr.mxu1 %v29_v11 }
   0xd   :  { %104 = vmatpush1.msra.mxu0 %v28_v12  ;;  %315 = vmatpush1.msra.mxu1 %v28_v12 }
   0xe   :  { %105 = vmatprep.subr.mxu0 %v27_v13  ;;  %308 = vmatprep.subr.mxu1 %v27_v13 }
   0xf   :  { %106 = vmatpush1.msra.mxu0 %v26_v14  ;;  %316 = vmatpush1.msra.mxu1 %v26_v14 }
  0x10   :  { %107 = vmatprep.subr.mxu0 %v25_v15  ;;  %309 = vmatprep.subr.mxu1 %v25_v15 }
  0x11   :  { %108 = vmatpush1.msra.mxu0 %v24_v16  ;;  %317 = vmatpush1.msra.mxu1 %v24_v16 }
  0x12   :  { %294 = vmatmul.mubr.msk.f32.vlgmr.msra.gmra.mxu0 %vm52_vm0, %v16_v17  ;;  %298 = vmatmul.mubr.msk.f32.vlgmr.msra.gmra.mxu1 %vm52_vm0, %v20_v18 }
  0x13   :  { %147 = vmatprep.mubr.f32.mxu0 %v319_v3  ;;  %171 = vmatprep.mubr.f32.mxu1 %v319_v3 }
  0x16   :  { %295 = vmatmul.mubr.msk.f32.gmra.mxu0 %vm52_vm0, %v17_v19  ;;  %299 = vmatmul.mubr.msk.f32.gmra.mxu1 %vm52_vm0, %v21_v20 }
  0x17   :  { %153 = vmatprep.mubr.f32.mxu0 %v319_v3  ;;  %177 = vmatprep.mubr.f32.mxu1 %v319_v3 }
  0x1a   :  { %296 = vmatmul.mubr.msk.f32.gmra.mxu0 %vm52_vm0, %v18_v21  ;;  %300 = vmatmul.mubr.msk.f32.gmra.mxu1 %vm52_vm0, %v22_v22 }
  0x1b   :  { %159 = vmatprep.mubr.f32.mxu0 %v319_v3  ;;  %183 = vmatprep.mubr.f32.mxu1 %v319_v3 }
  0x1e   :  { %297 = vmatmul.mubr.msk.f32.gmra.mxu0 %vm52_vm0, %v19_v23  ;;  %301 = vmatmul.mubr.msk.f32.gmra.mxu1 %vm52_vm0, %v23_v24 }
  0xd2   :  { %v143_v32 = vpop.f32.mrf.mxu0  ;;  %v167_v33 = vpop.f32.mrf.mxu1 }
  0xd3   :  { %v144_v34 = vadd.f32 %v143_v32, %v45_v30  ;;  %v168_v35 = vadd.f32 %v167_v33, %v45_v30 }
  0xd4   :  { %v145_v36 = vpop.f32.mrf.mxu0  ;;  %v169_v37 = vpop.f32.mrf.mxu1 }
  0xd5   :  { %190 = vst [vmem:[%s493_s3] sm:$0xff] %v144_v34  ;;  %v146_v38 = vadd.f32 %v145_v36, %v49_v31  ;;  %198 = vst [vmem:[%s493_s3 + $0x40] sm:$0xff] %v168_v35  ;;  %v170_v39 = vadd.f32 %v169_v37, %v49_v31  ;;  %v264_v55 = vmul.f32 %v144_v34, %v144_v34 }
  0xd6   :  { %v149_v40 = vpop.f32.mrf.mxu0  ;;  %v173_v41 = vpop.f32.mrf.mxu1  ;;  %v268_v9 = vmul.f32 %v168_v35, %v168_v35 }
  0xd7   :  { %191 = vst [vmem:[%s493_s3 + $0x8] sm:$0xff] %v146_v38  ;;  %v150_v42 = vadd.f32 %v149_v40, %v45_v30  ;;  %199 = vst [vmem:[%s493_s3 + $0x48] sm:$0xff] %v170_v39  ;;  %v174_v43 = vadd.f32 %v173_v41, %v45_v30 }
  0xd8   :  { %v151_v44 = vpop.f32.mrf.mxu0  ;;  %v175_v45 = vpop.f32.mrf.mxu1 }
  0xd9   :  { %192 = vst [vmem:[%s493_s3 + $0x10] sm:$0xff] %v150_v42  ;;  %v152_v46 = vadd.f32 %v151_v44, %v49_v31  ;;  %200 = vst [vmem:[%s493_s3 + $0x50] sm:$0xff] %v174_v43  ;;  %v176_v48 = vadd.f32 %v175_v45, %v49_v31  ;;  %v265_v50 = vmul.f32 %v150_v42, %v150_v42 }
  0xda   :  { %v155_v47 = vpop.f32.mrf.mxu0  ;;  %v179_v49 = vpop.f32.mrf.mxu1  ;;  %v250_v56 = vadd.f32 %v150_v42, %v144_v34  ;;  %v269_v12 = vmul.f32 %v174_v43, %v174_v43 }
  0xdb   :  { %193 = vst [vmem:[%s493_s3 + $0x18] sm:$0xff] %v152_v46  ;;  %v156_v51 = vadd.f32 %v155_v47, %v45_v30  ;;  %v180_v52 = vadd.f32 %v179_v49, %v45_v30  ;;  %201 = vst [vmem:[%s493_s3 + $0x58] sm:$0xff] %v176_v48  ;;  %v272_v62 = vadd.f32 %v265_v50, %v264_v55 }
  0xdc   :  { %v157_v53 = vpop.f32.mrf.mxu0  ;;  %v181_v54 = vpop.f32.mrf.mxu1 }
  0xdd   :  { %194 = vst [vmem:[%s493_s3 + $0x20] sm:$0xff] %v156_v51  ;;  %v266_v57 = vmul.f32 %v156_v51, %v156_v51  ;;  %v158_v58 = vadd.f32 %v157_v53, %v49_v31  ;;  %202 = vst [vmem:[%s493_s3 + $0x60] sm:$0xff] %v180_v52  ;;  %v182_v60 = vadd.f32 %v181_v54, %v49_v31 }
  0xde   :  { %v161_v59 = vpop.f32.mrf.mxu0  ;;  %v185_v61 = vpop.f32.mrf.mxu1  ;;  %v251_v63 = vadd.f32 %v250_v56, %v156_v51  ;;  %v270_v16 = vmul.f32 %v180_v52, %v180_v52 }
  0xdf   :  { %195 = vst [vmem:[%s493_s3 + $0x28] sm:$0xff] %v158_v58  ;;  %v162_v0 = vadd.f32 %v161_v59, %v45_v30  ;;  %v186_v1 = vadd.f32 %v185_v61, %v45_v30  ;;  %203 = vst [vmem:[%s493_s3 + $0x68] sm:$0xff] %v182_v60  ;;  %v273_v4 = vadd.f32 %v272_v62, %v266_v57 }
  0xe0   :  { %v163_v2 = vpop.f32.mrf.mxu0  ;;  %v187_v3 = vpop.f32.mrf.mxu1 }
  0xe1   :  { %196 = vst [vmem:[%s493_s3 + $0x30] sm:$0xff] %v162_v0  ;;  %v252_v5 = vadd.f32 %v251_v63, %v162_v0  ;;  %v267_v6 = vmul.f32 %v162_v0, %v162_v0  ;;  %v164_v7 = vadd.f32 %v163_v2, %v49_v31  ;;  %204 = vst [vmem:[%s493_s3 + $0x70] sm:$0xff] %v186_v1 }
  0xe2   :  { %v188_v8 = vadd.f32 %v187_v3, %v49_v31  ;;  %v271_v18 = vmul.f32 %v186_v1, %v186_v1 }
  0xe3   :  { %v253_v10 = vadd.f32 %v252_v5, %v168_v35  ;;  %v274_v11 = vadd.f32 %v273_v4, %v267_v6  ;;  %197 = vst [vmem:[%s493_s3 + $0x38] sm:$0xff] %v164_v7 }
  0xe4   :  { %205 = vst [vmem:[%s493_s3 + $0x78] sm:$0xff] %v188_v8 }
  0xe5   :  { %v275_v13 = vadd.f32 %v274_v11, %v268_v9  ;;  %v254_v14 = vadd.f32 %v253_v10, %v174_v43 }
  0xe7   :  { %v255_v15 = vadd.f32 %v254_v14, %v180_v52  ;;  %v276_v17 = vadd.f32 %v275_v13, %v269_v12 }
  0xe9   :  { %v277_v19 = vadd.f32 %v276_v17, %v270_v16  ;;  %v256_v20 = vadd.f32 %v255_v15, %v186_v1 }
  0xeb   :  { %v257_v21 = vrot.slane %v256_v20, 4  ;;  %v278_v22 = vadd.f32 %v277_v19, %v271_v18 }
  0xed   :  { %v258_v23 = vadd.f32 %v257_v21, %v256_v20  ;;  %v279_v24 = vrot.slane %v278_v22, 4 }
  0xef   :  { %v259_v25 = vrot.slane %v258_v23, 2  ;;  %v280_v26 = vadd.f32 %v279_v24, %v278_v22 }
  0xf1   :  { %v260_v27 = vadd.f32 %v259_v25, %v258_v23  ;;  %v281_v28 = vrot.slane %v280_v26, 2 }
  0xf3   :  { %v261_v29 = vrot.slane %v260_v27, 1  ;;  %v282_v30 = vadd.f32 %v281_v28, %v280_v26 }
  0xf5   :  { %v262_v31 = vadd.f32 %v261_v29, %v260_v27  ;;  %v283_v32 = vrot.slane %v282_v30, 1 }
  0xf7   :  { %263 = vst [vmem:[%s494_s4] sm:$0x1] %v262_v31  ;;  %v284_v33 = vadd.f32 %v283_v32, %v282_v30 }
  0xf9   :  { %285 = vst [vmem:[%s494_s4 + $0x1] sm:$0x1] %v284_v33 }

// kernel: malconv_forward.5
= control target key start
LH: loop header
LB: loop body
LE: loop exit
PB: predicated region body
PF: predicated region fallthrough
CT: control target
= control target key end

     0   :  { %v369_v0 = vmov 0.0   ;;  %vm370_vm0 = vmmov 0   ;;  %vm120_vm1 = vcmask 1043456   ;;  %s559_s1 = inlined_call_operand.vmem [shape: f32[128,128], index: 1, kind: input, shape index: {}]   ;;  %s560_s0 = inlined_call_operand.vmem [shape: f32[4,128], index: 0, kind: input, shape index: {}]   ;;  %s561_s5 = inlined_call_operand.vmem [shape: f32[128,128], index: 5, kind: input, shape index: {}]   ;;  %s562_s2 = inlined_call_operand.vmem [shape: f32[1,128], index: 2, kind: input, shape index: {}]   ;;  %s563_s3 = inlined_call_operand.vmem [shape: f32[1,128], index: 3, kind: input, shape index: {}]   ;;  %s564_s4 = inlined_call_operand.vmem [shape: f32[1,128], index: 4, kind: input, shape index: {}]   ;;  %s565_s6 = inlined_call_operand.vmem [shape: f32[1,128], index: 6, kind: input, shape index: {}]   ;;  %s566_s7 = inlined_call_operand.vmem [shape: f32[4,128], index: 7, kind: output, shape index: {}]  }
   0x1   :  { %295 = vmatprep.subr.mxu0 %v369_v0  ;;  %v42_v1 = vld [vmem:[%s559_s1 + $0x78] sm:$0xff]  ;;  %v41_v2 = vld [vmem:[%s559_s1 + $0x70] sm:$0xff]  ;;  %327 = vmatprep.mubr.msk.f32.mxu0 %vm370_vm0, %v369_v0  ;;  %v40_v3 = vld [vmem:[%s559_s1 + $0x68] sm:$0xff] }
   0x2   :  { %296 = vmatpush3.msra.mxu0 %v42_v1  ;;  %330 = vmatprep.subr.mxu1 %v369_v0  ;;  %v39_v4 = vld [vmem:[%s559_s1 + $0x60] sm:$0xff]  ;;  %v38_v5 = vld [vmem:[%s559_s1 + $0x58] sm:$0xff]  ;;  %v37_v6 = vld [vmem:[%s559_s1 + $0x50] sm:$0xff] }
   0x3   :  { %297 = vmatprep.subr.mxu0 %v369_v0  ;;  %362 = vmatprep.mubr.msk.f32.mxu1 %vm370_vm0, %v369_v0  ;;  %v36_v7 = vld [vmem:[%s559_s1 + $0x48] sm:$0xff]  ;;  %v35_v8 = vld [vmem:[%s559_s1 + $0x40] sm:$0xff]  ;;  %v34_v9 = vld [vmem:[%s559_s1 + $0x38] sm:$0xff] }
   0x4   :  { %298 = vmatpush3.msra.mxu0 %v41_v2  ;;  %v33_v10 = vld [vmem:[%s559_s1 + $0x30] sm:$0xff]  ;;  %v32_v11 = vld [vmem:[%s559_s1 + $0x28] sm:$0xff]  ;;  %v31_v12 = vld [vmem:[%s559_s1 + $0x20] sm:$0xff] }
   0x5   :  { %299 = vmatprep.subr.mxu0 %v369_v0  ;;  %v30_v13 = vld [vmem:[%s559_s1 + $0x18] sm:$0xff]  ;;  %v29_v14 = vld [vmem:[%s559_s1 + $0x10] sm:$0xff]  ;;  %v28_v15 = vld [vmem:[%s559_s1 + $0x8] sm:$0xff] }
   0x6   :  { %300 = vmatpush3.msra.mxu0 %v40_v3  ;;  %v27_v16 = vld [vmem:[%s559_s1] sm:$0xff]  ;;  %v174_v18 = vld [vmem:[%s561_s5 + $0x78] sm:$0xff]  ;;  %v173_v19 = vld [vmem:[%s561_s5 + $0x70] sm:$0xff] }
   0x7   :  { %301 = vmatprep.subr.mxu0 %v369_v0  ;;  %v26_v17 = vld [vmem:[%s560_s0] sm:$0xf]  ;;  %331 = vmatpush3.msra.mxu1 %v174_v18  ;;  %v172_v20 = vld [vmem:[%s561_s5 + $0x68] sm:$0xff]  ;;  %v170_v22 = vld [vmem:[%s561_s5 + $0x58] sm:$0xff] }
   0x8   :  { %302 = vmatpush3.msra.mxu0 %v39_v4  ;;  %332 = vmatprep.subr.mxu1 %v369_v0  ;;  %v171_v21 = vld [vmem:[%s561_s5 + $0x60] sm:$0xff]  ;;  %v169_v23 = vld [vmem:[%s561_s5 + $0x50] sm:$0xff]  ;;  %v168_v24 = vld [vmem:[%s561_s5 + $0x48] sm:$0xff] }
   0x9   :  { %303 = vmatprep.subr.mxu0 %v369_v0  ;;  %333 = vmatpush3.msra.mxu1 %v173_v19  ;;  %v167_v25 = vld [vmem:[%s561_s5 + $0x40] sm:$0xff]  ;;  %v166_v26 = vld [vmem:[%s561_s5 + $0x38] sm:$0xff]  ;;  %v165_v27 = vld [vmem:[%s561_s5 + $0x30] sm:$0xff] }
   0xa   :  { %304 = vmatpush3.msra.mxu0 %v38_v5  ;;  %334 = vmatprep.subr.mxu1 %v369_v0  ;;  %v164_v28 = vld [vmem:[%s561_s5 + $0x28] sm:$0xff]  ;;  %v163_v29 = vld [vmem:[%s561_s5 + $0x20] sm:$0xff]  ;;  %v162_v30 = vld [vmem:[%s561_s5 + $0x18] sm:$0xff] }
   0xb   :  { %305 = vmatprep.subr.mxu0 %v369_v0  ;;  %335 = vmatpush3.msra.mxu1 %v172_v20  ;;  %v161_v31 = vld [vmem:[%s561_s5 + $0x10] sm:$0xff]  ;;  %v160_v32 = vld [vmem:[%s561_s5 + $0x8] sm:$0xff]  ;;  %v159_v33 = vld [vmem:[%s561_s5] sm:$0xff] }
   0xc   :  { %306 = vmatpush3.msra.mxu0 %v37_v6  ;;  %336 = vmatprep.subr.mxu1 %v369_v0  ;;  %v257_v34 = vld [vmem:[%s562_s2] ss:$0 sm:$0xff] }
   0xd   :  { %307 = vmatprep.subr.mxu0 %v369_v0  ;;  %337 = vmatpush3.msra.mxu1 %v171_v21  ;;  %v258_v58 = vld [vmem:[%s563_s3] ss:$0 sm:$0xff] }
   0xe   :  { %308 = vmatpush3.msra.mxu0 %v36_v7  ;;  %338 = vmatprep.subr.mxu1 %v369_v0  ;;  %v259_v60 = vld [vmem:[%s564_s4] ss:$0 sm:$0xff] }
   0xf   :  { %309 = vmatprep.subr.mxu0 %v369_v0  ;;  %339 = vmatpush3.msra.mxu1 %v170_v22  ;;  %v260_v63 = vld [vmem:[%s565_s6] ss:$0 sm:$0xff] }
  0x10   :  { %310 = vmatpush3.msra.mxu0 %v35_v8  ;;  %340 = vmatprep.subr.mxu1 %v369_v0 }
  0x11   :  { %311 = vmatprep.subr.mxu0 %v369_v0  ;;  %341 = vmatpush3.msra.mxu1 %v169_v23 }
  0x12   :  { %312 = vmatpush3.msra.mxu0 %v34_v9  ;;  %342 = vmatprep.subr.mxu1 %v369_v0 }
  0x13   :  { %313 = vmatprep.subr.mxu0 %v369_v0  ;;  %343 = vmatpush3.msra.mxu1 %v168_v24 }
  0x14   :  { %314 = vmatpush3.msra.mxu0 %v33_v10  ;;  %344 = vmatprep.subr.mxu1 %v369_v0 }
  0x15   :  { %315 = vmatprep.subr.mxu0 %v369_v0  ;;  %345 = vmatpush3.msra.mxu1 %v167_v25 }
  0x16   :  { %316 = vmatpush3.msra.mxu0 %v32_v11  ;;  %346 = vmatprep.subr.mxu1 %v369_v0 }
  0x17   :  { %317 = vmatprep.subr.mxu0 %v369_v0  ;;  %347 = vmatpush3.msra.mxu1 %v166_v26 }
  0x18   :  { %318 = vmatpush3.msra.mxu0 %v31_v12  ;;  %348 = vmatprep.subr.mxu1 %v369_v0 }
  0x19   :  { %319 = vmatprep.subr.mxu0 %v369_v0  ;;  %349 = vmatpush3.msra.mxu1 %v165_v27 }
  0x1a   :  { %320 = vmatpush3.msra.mxu0 %v30_v13  ;;  %350 = vmatprep.subr.mxu1 %v369_v0 }
  0x1b   :  { %321 = vmatprep.subr.mxu0 %v369_v0  ;;  %351 = vmatpush3.msra.mxu1 %v164_v28 }
  0x1c   :  { %322 = vmatpush3.msra.mxu0 %v29_v14  ;;  %352 = vmatprep.subr.mxu1 %v369_v0 }
  0x1d   :  { %323 = vmatprep.subr.mxu0 %v369_v0  ;;  %353 = vmatpush3.msra.mxu1 %v163_v29 }
  0x1e   :  { %324 = vmatpush3.msra.mxu0 %v28_v15  ;;  %354 = vmatprep.subr.mxu1 %v369_v0 }
  0x1f   :  { %325 = vmatprep.subr.mxu0 %v369_v0  ;;  %355 = vmatpush3.msra.mxu1 %v162_v30 }
  0x20   :  { %326 = vmatpush3.msra.mxu0 %v27_v16  ;;  %356 = vmatprep.subr.mxu1 %v369_v0 }
  0x21   :  { %328 = vmatmul.mubr.f32.vlgmr.msra.gmra.mxu0 %v26_v17  ;;  %357 = vmatpush3.msra.mxu1 %v161_v31 }
  0x22   :  { %358 = vmatprep.subr.mxu1 %v369_v0 }
  0x23   :  { %359 = vmatpush3.msra.mxu1 %v160_v32 }
  0x24   :  { %360 = vmatprep.subr.mxu1 %v369_v0 }
  0x25   :  { %361 = vmatpush3.msra.mxu1 %v159_v33 }
  0xe1   :  { %v116_v35 = vpop.f32.mrf.mxu0 }
  0xe2   :  { %v117_v36 = vadd.f32 %v257_v34, %v116_v35 }
  0xe3   :  { %v329_v37 = vpop.f32.mrf.mxu0 }
  0xe4   :  { %v121_v38 = vsel %vm120_vm1, %v117_v36, 0.0 }
  0xe5   :  { %v122_v39 = vrot.slane %v121_v38, 4 }
  0xe7   :  { %v123_v40 = vadd.f32 %v122_v39, %v121_v38 }
  0xe9   :  { %v124_v41 = vrot.slane %v123_v40, 2 }
  0xeb   :  { %v125_v42 = vadd.f32 %v124_v41, %v123_v40 }
  0xed   :  { %v126_v43 = vrot.slane %v125_v42, 1 }
  0xef   :  { %v127_v44 = vadd.f32 %v126_v43, %v125_v42 }
  0xf1   :  { %v129_v45 = vmul.f32 0.25, %v127_v44 }
  0xf3   :  { %v130_v46 = vsub.f32 %v117_v36, %v129_v45 }
  0xf5   :  { %v131_v47 = vmul.f32 %v130_v46, %v130_v46 }
  0xf7   :  { %v132_v48 = vsel %vm120_vm1, %v131_v47, 0.0 }
  0xf8   :  { %v133_v49 = vrot.slane %v132_v48, 4 }
  0xfa   :  { %v134_v50 = vadd.f32 %v133_v49, %v132_v48 }
  0xfc   :  { %v135_v51 = vrot.slane %v134_v50, 2 }
  0xfe   :  { %v136_v52 = vadd.f32 %v135_v51, %v134_v50 }
 0x100   :  { %v137_v53 = vrot.slane %v136_v52, 1 }
 0x102   :  { %v138_v54 = vadd.f32 %v137_v53, %v136_v52 }
 0x104   :  { %v139_v55 = vmul.f32 0.25, %v138_v54 }
 0x106   :  { %v140_v56 = vadd.f32 1e-05, %v139_v55 }
 0x108   :  { %367 = vrsqrt.f32 %v140_v56 }
 0x115   :  { %v368_v57 = vpop.eup %367 }
 0x116   :  { %v142_v59 = vmul.f32 %v368_v57, %v130_v46 }
 0x118   :  { %v150_v61 = vmul.f32 %v258_v58, %v142_v59 }
 0x11a   :  { %v158_v62 = vadd.f32 %v259_v60, %v150_v61 }
 0x11c   :  { %363 = vmatmul.mubr.f32.vlgmr.msra.gmra.mxu1 %v158_v62 }
 0x1dc   :  { %v248_v0 = vpop.f32.mrf.mxu1 }
 0x1dd   :  { %v249_v1 = vadd.f32 %v260_v63, %v248_v0 }
 0x1de   :  { %v364_v2 = vpop.f32.mrf.mxu1 }
 0x1df   :  { %252 = vst [vmem:[%s566_s7] sm:$0xf] %v249_v1 }

// kernel: malconv_forward.4
= control target key start
LH: loop header
LB: loop body
LE: loop exit
PB: predicated region body
PF: predicated region fallthrough
CT: control target
= control target key end

     0   :  { %s465_s12 = smov 0   ;;  %s467_s13 = smov 0   ;;  %s508_s0 = inlined_call_operand.vmem [shape: f32[4,16,256], index: 0, kind: input, shape index: {}]   ;;  %s509_s1 = inlined_call_operand.vmem [shape: f32[1,128], index: 1, kind: input, shape index: {}]   ;;  %s510_s2 = inlined_call_operand.vmem [shape: f32[1,128], index: 2, kind: input, shape index: {}]   ;;  %s511_s3 = inlined_call_operand.vmem [shape: f32[1,4,1,128], index: 3, kind: output, shape index: {}]  }
   0x1   :  { %s469_s14 = smov 0  }
   0x2 LB: > { %s28_s15 = sadd.s32 1, %s439_s13  ;;  %p379_p0 = scmp.ge.s32.totalorder %s443_s14, 1  ;;  %s443_s14 = sphi %s469_s14, %s13_s14   ;;  %s439_s13 = sphi %s467_s13, %s513_s13   ;;  %s435_s12 = sphi %s465_s12, %s512_s12  }
   0x3   : > { %p30_p1 = scmp.ge.s32.totalorder %s28_s15, 4  ;;  %p170_p2 = scmp.lt.s32.totalorder %s443_s14, 5 }
   0x5   : > { %s515_s15 = smov (%p30_p1, %s28_s15), 0  ;;  %p171_p3 = pnand %p379_p0, %p170_p2 }
   0x6   : > { %p204_p4 = scmp.lt.s32.totalorder (!%p171_p3), %s435_s12, 3 }
   0x7   : > { %174 = sbr.rel (%p171_p3) target bundleno = 66 (0x42), region = 32 }
   0xc   : > { %s517_s12 = smov (!%p204_p4, %s435_s12), 3  ;;  %v382_v9 = vld [vmem:[%s509_s1] ss:$0 sm:$0xff] }
   0xd   : > { %s388_s16 = sshll.u32 %s517_s12, 5  ;;  %v383_v13 = vld [vmem:[%s510_s2] ss:$0 sm:$0xff]  ;;  %s221_s26 = scalar_lea.vmem %s511_s3, %s517_s12 }
   0xe   : > { %s212_s19 = scalar_lea.vmem %s508_s0, %s388_s16 }
   0xf   : > { %v223_v0 = vld [vmem:[%s212_s19 + $0x8] sm:$0xff]  ;;  %v225_v1 = vld [vmem:[%s212_s19 + $0x18] sm:$0xff]  ;;  %v222_v8 = vld [vmem:[%s212_s19] sm:$0xff] }
  0x10   : > { %v384_v2 = vmul.f32 -1.442695, %v223_v0  ;;  %v385_v3 = vmul.f32 -1.442695, %v225_v1  ;;  %v224_v10 = vld [vmem:[%s212_s19 + $0x10] sm:$0xff]  ;;  %v233_v11 = vmul.f32 %v382_v9, %v222_v8 }
  0x11   : > { %v234_v12 = vmul.f32 %v382_v9, %v224_v10 }
  0x12   : > { %413 = vpow2.f32 %v384_v2  ;;  %v242_v14 = vadd.f32 %v383_v13, %v233_v11 }
  0x13   : > { %415 = vpow2.f32 %v385_v3  ;;  %v243_v15 = vadd.f32 %v383_v13, %v234_v12 }
  0x1f   : > { %v414_v4 = vpop.eup %413 }
  0x20   : > { %v416_v5 = vpop.eup %415  ;;  %v250_v6 = vadd.f32 1.0, %v414_v4 }
  0x21   : > { %v251_v7 = vadd.f32 1.0, %v416_v5 }
  0x22   : > { %417 = vrcp.f32 %v250_v6 }
  0x23   : > { %419 = vrcp.f32 %v251_v7 }
  0x2f   : > { %v418_v16 = vpop.eup %417 }
  0x30   : > { %v420_v17 = vpop.eup %419  ;;  %v256_v18 = vmul.f32 %v418_v16, %v242_v14 }
  0x31   : > { %v257_v19 = vmul.f32 %v420_v17, %v243_v15 }
  0x33   : > { %v273_v20 = vmax.f32 %v256_v18, %v257_v19 }
  0x35   : > { %v274_v21 = vrot.slane %v273_v20, 4 }
  0x37   : > { %v275_v22 = vmax.f32 %v273_v20, %v274_v21 }
  0x39   : > { %v276_v23 = vrot.slane %v275_v22, 2 }
  0x3b   : > { %v277_v24 = vmax.f32 %v275_v22, %v276_v23 }
  0x3d   : > { %v278_v25 = vrot.slane %v277_v24, 1 }
  0x3f   : > { %v279_v26 = vmax.f32 %v277_v24, %v278_v25 }
  0x41   : > { %284 = vst [vmem:[%s221_s26] sm:$0x1] %v279_v26 }
  0x42 PF: > { %s13_s14 = sadd.s32 1, %s443_s14   ;;  %s512_s12 = smov %s439_s13 }
  0x43   : > { %p10_p5 = scmp.ge.s32.totalorder %s13_s14, 6   ;;  %s513_s13 = smov %s515_s15 }
  0x45   :  { %12 = sbr.rel (!%p10_p5) target bundleno = 2 (0x2), region = 70 }

</bundles_post_ra>
